<compile_context>
chip_gen: v7x
topology: tpu7x:2x2x1
jax: 0.10.0
libtpu: 0.0.40
codegen_flags: <defaults>
</compile_context>

<pallas_src>
import functools
import math

import numpy as np
import jax
import jax.numpy as jnp
from jax.experimental import pallas as pl
from jax.experimental.pallas import tpu as pltpu

KS = 3                      # temporal kernel size
DILATIONS = (1, 2, 3, 4)
NUM_BRANCHES = len(DILATIONS) + 2
BN_EPS = 1e-5

# TODO(synk): training-mode BatchNorm (per-batch statistics) is not implemented;
# eval-mode BN with deterministic running stats is folded into the convs.
# TODO(synk): stride != 1 and the identity-residual (Cin == Cout) variants are
# not implemented (module defaults: stride=1, conv residual).
# TODO(synk): for very long sequences add a halo-overlapped time-tile grid axis
# so the per-step live set stays well under v7x's 64 MiB VMEM.


# ----------------------------------------------------------------------------
# Pallas kernel
# ----------------------------------------------------------------------------
def _msc_kernel(x_ref, wall_ref, ball_ref, wt_ref, ps_ref, o_ref, hp_ref, *,
                V, bc, pad):
    bf16 = jnp.bfloat16
    x2d = x_ref[0].astype(bf16)                        # (Cin, M)
    M = x2d.shape[1]
    WREL = 5 * bc                                      # rows that get ReLU

    # One fused MXU matmul: 6 branch 1x1 convs + residual 1x1 (+ folded BNs).
    y = jnp.dot(wall_ref[...], x2d,
                preferred_element_type=jnp.float32) + ball_ref[...]

    # Branches 0..4: ReLU, quantize to bf16 values (kept in f32 storage) and
    # park them, zero-padded in time, in the VMEM scratch.
    h = jnp.maximum(y[:WREL, :], 0.0).astype(bf16).astype(jnp.float32)
    zeros = jnp.zeros((WREL, pad), jnp.float32)
    hp_ref[:, pl.ds(0, pad)] = zeros                   # left halo
    hp_ref[:, pl.ds(pad + M, pad)] = zeros             # right halo
    hp_ref[:, pl.ds(pad, M)] = h

    outs = []
    # Four dilated temporal-conv branches: 3 taps fused into one K=3*bc matmul.
    for bi, d in enumerate(DILATIONS):
        taps = [hp_ref[pl.ds(bi * bc, bc), pl.ds(pad + (k - 1) * d * V, M)]
                for k in range(KS)]
        stacked = jnp.concatenate(taps, axis=0).astype(bf16)    # (3*bc, M)
        outs.append(jnp.dot(wt_ref[bi], stacked,
                            preferred_element_type=jnp.float32))

    # Max-pool branch: (3,1) max pool with "same" padding.  The zero halo is
    # equivalent to -inf padding because h >= 0 after the ReLU.
    c0 = 4 * bc
    pool = hp_ref[pl.ds(c0, bc), pl.ds(pad, M)]
    pool = jnp.maximum(pool, hp_ref[pl.ds(c0, bc), pl.ds(pad - V, M)])
    pool = jnp.maximum(pool, hp_ref[pl.ds(c0, bc), pl.ds(pad + V, M)])
    outs.append(pool * ps_ref[...])                    # folded BN scale

    # Plain 1x1 branch straight out of the fused matmul (no ReLU).
    outs.append(y[WREL:WREL + bc, :])

    # Residual (its bias already carries all trailing per-branch BN shifts).
    res = y[WREL + bc:, :]
    out = jnp.concatenate(outs, axis=0) + res          # (Cout, M), lane dense
    o_ref[0, :, :] = out.astype(o_ref.dtype)


def multiscale_temporal_conv(x_nchw, pk):
    """x_nchw: (N, Cin, T, V) float32 -> (N, Cout, T, V) float32."""
    N, Cin, T, V = x_nchw.shape
    bc = pk["pscale"].shape[0]
    Cout = NUM_BRANCHES * bc
    M = T * V
    pad = max(DILATIONS) * V                           # temporal halo (lanes)
    Wr = pk["w_all"].shape[0]                          # 6*bc + Cout

    x = x_nchw.reshape(N, Cin, M)                      # free reshape (no transpose)

    flops = N * M * 2 * (Wr * Cin + len(DILATIONS) * bc * KS * bc)
    bytes_accessed = (x.size * x.dtype.itemsize + N * Cout * M * 4
                      + pk["w_all"].size * 2 + pk["wt"].size * 2
                      + pk["b_all"].size * 4 + pk["pscale"].size * 4)
    vmem_est = (2 * Cin * M * 4 + 2 * Cout * M * 4     # in/out double buffers
                + 5 * bc * (M + 2 * pad) * 4           # scratch
                + 8 * Cout * M * 4)                    # live intermediates
    vmem_limit = int(min(max(4 * vmem_est, 16 * 2**20), 48 * 2**20))

    kernel = functools.partial(_msc_kernel, V=V, bc=bc, pad=pad)
    out = pl.pallas_call(
        kernel,
        out_shape=jax.ShapeDtypeStruct((N, Cout, M), jnp.float32),
        grid=(N,),
        in_specs=[
            pl.BlockSpec((1, Cin, M), lambda n: (n, 0, 0)),
            pl.BlockSpec(pk["w_all"].shape, lambda n: (0, 0)),
            pl.BlockSpec(pk["b_all"].shape, lambda n: (0, 0)),
            pl.BlockSpec(pk["wt"].shape, lambda n: (0, 0, 0)),
            pl.BlockSpec(pk["pscale"].shape, lambda n: (0, 0)),
        ],
        out_specs=pl.BlockSpec((1, Cout, M), lambda n: (n, 0, 0)),
        scratch_shapes=[pltpu.VMEM((5 * bc, M + 2 * pad), jnp.float32)],
        compiler_params=pltpu.CompilerParams(
            dimension_semantics=("parallel",),
            vmem_limit_bytes=vmem_limit),
        cost_estimate=pl.CostEstimate(flops=flops, transcendentals=0,
                                      bytes_accessed=bytes_accessed),
    )(x, pk["w_all"], pk["b_all"], pk["wt"], pk["pscale"])

    return out.reshape(N, Cout, T, V)


# ----------------------------------------------------------------------------
# Deterministic parameter construction (weights_init semantics) + BN folding
# ----------------------------------------------------------------------------
def _kaiming(key, out_c, in_c, kh, kw):
    fan_out = out_c * kh * kw
    std = math.sqrt(2.0 / fan_out)
    return std * jax.random.normal(key, (out_c, in_c, kh, kw), dtype=jnp.float32)


def _bn(key, c):
    k1, k2, k3 = jax.random.split(key, 3)
    gamma = 1.0 + 0.02 * jax.random.normal(k1, (c,), dtype=jnp.float32)
    beta = jnp.zeros((c,), jnp.float32)
    mean = 0.1 * jax.random.normal(k2, (c,), dtype=jnp.float32)
    var = jax.random.uniform(k3, (c,), jnp.float32, 0.5, 1.5)
    return gamma, beta, mean, var


def _fold(gamma, beta, mean, var):
    s = gamma / jnp.sqrt(var + BN_EPS)
    return s, beta - mean * s          # y = conv_out * s + shift (conv bias = 0)


def init_params(key, cin, cout):
    """Folded, fused, kernel-ready parameters."""
    assert cout % NUM_BRANCHES == 0
    bc = cout // NUM_BRANCHES
    keys = iter(jax.random.split(key, 32))

    # 1x1 conv (+BN) of every branch, row-major (bc, cin).
    w1_rows, b1_rows = [], []
    for _ in range(NUM_BRANCHES):
        w = _kaiming(next(keys), bc, cin, 1, 1)[:, :, 0, 0]          # (bc, cin)
        s, sh = _fold(*_bn(next(keys), bc))
        w1_rows.append(w * s[:, None])
        b1_rows.append(sh)

    # Dilated TemporalConv (+BN): taps fused along K -> (co, KS*ci).
    wt_list, bt_list = [], []
    for _ in DILATIONS:
        w = _kaiming(next(keys), bc, bc, KS, 1)[:, :, :, 0]          # (co, ci, ks)
        s, sh = _fold(*_bn(next(keys), bc))
        w = w * s[:, None, None]
        wt_list.append(jnp.transpose(w, (0, 2, 1)).reshape(bc, KS * bc))
        bt_list.append(sh)

    # BN after the max-pool branch.
    ps, psh = _fold(*_bn(next(keys), bc))

    # Residual TemporalConv(k=1) (+BN).
    wr = _kaiming(next(keys), cout, cin, 1, 1)[:, :, 0, 0]           # (cout, cin)
    s, sh = _fold(*_bn(next(keys), cout))
    wr = wr * s[:, None]
    # Fold every trailing per-branch BN shift into the residual bias so the
    # kernel does a single bias add at the end.
    br = sh + jnp.concatenate(bt_list + [psh, jnp.zeros((bc,), jnp.float32)])

    w_all = jnp.concatenate(w1_rows + [wr], axis=0)                  # (6bc+cout, cin)
    b_all = jnp.concatenate(b1_rows + [br], axis=0)[:, None]         # (6bc+cout, 1)
    wt = jnp.stack(wt_list, axis=0)                                  # (4, bc, KS*bc)

    return dict(w_all=w_all.astype(jnp.bfloat16),                    # MXU: bf16
                b_all=b_all,                                         # f32 bias
                wt=wt.astype(jnp.bfloat16),
                pscale=ps[:, None])                                  # (bc, 1) f32


# ----------------------------------------------------------------------------
# Pure-JAX reference: original module structure (dilated conv via padding,
# -inf-padded max-pool), using the same bf16-quantized operands as the kernel.
# ----------------------------------------------------------------------------
def ref_forward(x_nchw, pk):
    N, Cin, T, V = x_nchw.shape
    bc = pk["pscale"].shape[0]
    w_all = pk["w_all"].astype(jnp.float32)
    b_all = pk["b_all"][:, 0]
    wt = pk["wt"].astype(jnp.float32)
    ps = pk["pscale"][:, 0]

    xq = x_nchw.astype(jnp.bfloat16).astype(jnp.float32)
    x = jnp.transpose(xq, (0, 2, 3, 1))                              # (N,T,V,Cin)
    ein = functools.partial(jnp.einsum, precision="highest")

    y = ein("ntvc,dc->ntvd", x, w_all) + b_all                       # all 1x1 convs
    h = jax.nn.relu(y[..., :5 * bc]).astype(jnp.bfloat16).astype(jnp.float32)

    outs = []
    for bi, d in enumerate(DILATIONS):
        hb = h[..., bi * bc:(bi + 1) * bc]
        hpad = jnp.pad(hb, ((0, 0), (d, d), (0, 0), (0, 0)))
        acc = 0.0
        for k in range(KS):
            wk = wt[bi, :, k * bc:(k + 1) * bc]                      # (co, ci)
            acc = acc + ein("ntvc,dc->ntvd", hpad[:, k * d:k * d + T], wk)
        outs.append(acc)

    hb = h[..., 4 * bc:5 * bc]
    hpad = jnp.pad(hb, ((0, 0), (1, 1), (0, 0), (0, 0)),
                   constant_values=-jnp.inf)
    pool = jnp.maximum(jnp.maximum(hpad[:, 0:T], hpad[:, 1:T + 1]),
                       hpad[:, 2:T + 2])
    outs.append(pool * ps)

    outs.append(y[..., 5 * bc:6 * bc])
    out = jnp.concatenate(outs, axis=-1) + y[..., 6 * bc:]
    return jnp.transpose(out, (0, 3, 1, 2))


if __name__ == "__main__":
    key = jax.random.PRNGKey(0)
    kx, kp = jax.random.split(key)

    N, Cin, T, V = 2, 4, 16, 16          # x is NCHW = (N, C, T, V)
    Cout = 12                            # multiple of 6 branches -> bc = 2

    x = jax.random.normal(kx, (N, Cin, T, V), dtype=jnp.float32)
    params = init_params(kp, Cin, Cout)

    out = jax.block_until_ready(multiscale_temporal_conv(x, params))
    ref = jax.block_until_ready(ref_forward(x, params))
    np.testing.assert_allclose(np.asarray(out), np.asarray(ref),
                               rtol=2e-2, atol=2e-2)
    print("KERNEL_OK")
</pallas_src>

<mosaic_0001>
module attributes {stable_mosaic.version = 11 : i64} {
  func.func @_msc_kernel(%arg0: i32, %arg1: memref<1x4x256xf32, #tpu.memory_space<vmem>>, %arg2: memref<24x4xbf16, #tpu.memory_space<vmem>>, %arg3: memref<24x1xf32, #tpu.memory_space<vmem>>, %arg4: memref<4x2x6xbf16, #tpu.memory_space<vmem>>, %arg5: memref<2x1xf32, #tpu.memory_space<vmem>>, %arg6: memref<1x12x256xf32, #tpu.memory_space<vmem>>, %arg7: memref<10x384xf32, #tpu.memory_space<vmem>>) attributes {dimension_semantics = [#tpu.dimension_semantics<parallel>], iteration_bounds = array<i64: 2>, scalar_prefetch = 0 : i64, scratch_operands = 1 : i64, tpu.core_type = #tpu.core_type<tc>, window_params = [{transform_indices = @transform_0, window_bounds = array<i64: 1, 4, 256>}, {pipeline_mode = #tpu.pipeline_mode<synchronous>, transform_indices = @transform_1, window_bounds = array<i64: 24, 4>}, {pipeline_mode = #tpu.pipeline_mode<synchronous>, transform_indices = @transform_2, window_bounds = array<i64: 24, 1>}, {pipeline_mode = #tpu.pipeline_mode<synchronous>, transform_indices = @transform_3, window_bounds = array<i64: 4, 2, 6>}, {pipeline_mode = #tpu.pipeline_mode<synchronous>, transform_indices = @transform_4, window_bounds = array<i64: 2, 1>}, {transform_indices = @transform_5, window_bounds = array<i64: 1, 12, 256>}]} {
    %c0 = arith.constant 0 : index
    %c0_0 = arith.constant 0 : index
    %c0_1 = arith.constant 0 : index
    %0 = vector.load %arg1[%c0, %c0_0, %c0_1] : memref<1x4x256xf32, #tpu.memory_space<vmem>>, vector<1x4x256xf32>
    %1 = vector.shape_cast %0 : vector<1x4x256xf32> to vector<4x256xf32>
    %2 = arith.truncf %1 : vector<4x256xf32> to vector<4x256xbf16>
    %c0_2 = arith.constant 0 : index
    %c0_3 = arith.constant 0 : index
    %3 = vector.load %arg2[%c0_2, %c0_3] : memref<24x4xbf16, #tpu.memory_space<vmem>>, vector<24x4xbf16>
    %cst = arith.constant dense<0.000000e+00> : vector<24x256xf32>
    %4 = tpu.matmul %3, %2, %cst {dimension_numbers = #tpu.dot_dimension_numbers<[1], [0], [0], [1], [0, 0, 1, 1], [], []>} : vector<24x4xbf16>, vector<4x256xbf16>, vector<24x256xf32> -> vector<24x256xf32>
    %c0_4 = arith.constant 0 : index
    %c0_5 = arith.constant 0 : index
    %5 = vector.load %arg3[%c0_4, %c0_5] : memref<24x1xf32, #tpu.memory_space<vmem>>, vector<24x1xf32>
    %6 = vector.broadcast %5 : vector<24x1xf32> to vector<24x256xf32>
    %7 = arith.addf %4, %6 : vector<24x256xf32>
    %8 = vector.extract_strided_slice %7 {offsets = [0, 0], sizes = [10, 256], strides = [1, 1]} : vector<24x256xf32> to vector<10x256xf32>
    %cst_6 = arith.constant 0.000000e+00 : f32
    %9 = vector.broadcast %cst_6 : f32 to vector<10x256xf32>
    %10 = arith.maximumf %8, %9 : vector<10x256xf32>
    %11 = arith.truncf %10 : vector<10x256xf32> to vector<10x256xbf16>
    %12 = arith.extf %11 : vector<10x256xbf16> to vector<10x256xf32>
    %cst_7 = arith.constant 0.000000e+00 : f32
    %13 = vector.broadcast %cst_7 : f32 to vector<10x64xf32>
    %c0_8 = arith.constant 0 : index
    %c0_9 = arith.constant 0 : index
    %14 = vector.load %arg7[%c0_8, %c0_9] : memref<10x384xf32, #tpu.memory_space<vmem>>, vector<10x64xf32>
    tpu.vector_store %arg7[%c0_8, %c0_9], %13 {strides = array<i32>} : memref<10x384xf32, #tpu.memory_space<vmem>>, vector<10x64xf32>,
    %c0_10 = arith.constant 0 : index
    %c320 = arith.constant 320 : index
    %15 = vector.load %arg7[%c0_10, %c320] : memref<10x384xf32, #tpu.memory_space<vmem>>, vector<10x64xf32>
    tpu.vector_store %arg7[%c0_10, %c320], %13 {strides = array<i32>} : memref<10x384xf32, #tpu.memory_space<vmem>>, vector<10x64xf32>,
    %c0_11 = arith.constant 0 : index
    %c64 = arith.constant 64 : index
    %16 = vector.load %arg7[%c0_11, %c64] : memref<10x384xf32, #tpu.memory_space<vmem>>, vector<10x256xf32>
    tpu.vector_store %arg7[%c0_11, %c64], %12 {strides = array<i32>} : memref<10x384xf32, #tpu.memory_space<vmem>>, vector<10x256xf32>,
    %c0_12 = arith.constant 0 : index
    %c48 = arith.constant 48 : index
    %17 = vector.load %arg7[%c0_12, %c48] : memref<10x384xf32, #tpu.memory_space<vmem>>, vector<2x256xf32>
    %c0_13 = arith.constant 0 : index
    %c64_14 = arith.constant 64 : index
    %18 = vector.load %arg7[%c0_13, %c64_14] : memref<10x384xf32, #tpu.memory_space<vmem>>, vector<2x256xf32>
    %c0_15 = arith.constant 0 : index
    %c80 = arith.constant 80 : index
    %19 = vector.load %arg7[%c0_15, %c80] : memref<10x384xf32, #tpu.memory_space<vmem>>, vector<2x256xf32>
    %20 = tpu.concatenate %17, %18, %19 in 0 : vector<2x256xf32>, vector<2x256xf32>, vector<2x256xf32> -> vector<6x256xf32>
    %21 = arith.truncf %20 : vector<6x256xf32> to vector<6x256xbf16>
    %c0_16 = arith.constant 0 : index
    %c0_17 = arith.constant 0 : index
    %c0_18 = arith.constant 0 : index
    %22 = vector.load %arg4[%c0_16, %c0_17, %c0_18] : memref<4x2x6xbf16, #tpu.memory_space<vmem>>, vector<1x2x6xbf16>
    %23 = vector.shape_cast %22 : vector<1x2x6xbf16> to vector<2x6xbf16>
    %cst_19 = arith.constant dense<0.000000e+00> : vector<2x256xf32>
    %24 = tpu.matmul %23, %21, %cst_19 {dimension_numbers = #tpu.dot_dimension_numbers<[1], [0], [0], [1], [0, 0, 1, 1], [], []>} : vector<2x6xbf16>, vector<6x256xbf16>, vector<2x256xf32> -> vector<2x256xf32>
    %c2 = arith.constant 2 : index
    %c32 = arith.constant 32 : index
    %25 = vector.load %arg7[%c2, %c32] : memref<10x384xf32, #tpu.memory_space<vmem>>, vector<2x256xf32>
    %c2_20 = arith.constant 2 : index
    %c64_21 = arith.constant 64 : index
    %26 = vector.load %arg7[%c2_20, %c64_21] : memref<10x384xf32, #tpu.memory_space<vmem>>, vector<2x256xf32>
    %c2_22 = arith.constant 2 : index
    %c96 = arith.constant 96 : index
    %27 = vector.load %arg7[%c2_22, %c96] : memref<10x384xf32, #tpu.memory_space<vmem>>, vector<2x256xf32>
    %28 = tpu.concatenate %25, %26, %27 in 0 : vector<2x256xf32>, vector<2x256xf32>, vector<2x256xf32> -> vector<6x256xf32>
    %29 = arith.truncf %28 : vector<6x256xf32> to vector<6x256xbf16>
    %c1 = arith.constant 1 : index
    %c0_23 = arith.constant 0 : index
    %c0_24 = arith.constant 0 : index
    %30 = vector.load %arg4[%c1, %c0_23, %c0_24] : memref<4x2x6xbf16, #tpu.memory_space<vmem>>, vector<1x2x6xbf16>
    %31 = vector.shape_cast %30 : vector<1x2x6xbf16> to vector<2x6xbf16>
    %cst_25 = arith.constant dense<0.000000e+00> : vector<2x256xf32>
    %32 = tpu.matmul %31, %29, %cst_25 {dimension_numbers = #tpu.dot_dimension_numbers<[1], [0], [0], [1], [0, 0, 1, 1], [], []>} : vector<2x6xbf16>, vector<6x256xbf16>, vector<2x256xf32> -> vector<2x256xf32>
    %c4 = arith.constant 4 : index
    %c16 = arith.constant 16 : index
    %33 = vector.load %arg7[%c4, %c16] : memref<10x384xf32, #tpu.memory_space<vmem>>, vector<2x256xf32>
    %c4_26 = arith.constant 4 : index
    %c64_27 = arith.constant 64 : index
    %34 = vector.load %arg7[%c4_26, %c64_27] : memref<10x384xf32, #tpu.memory_space<vmem>>, vector<2x256xf32>
    %c4_28 = arith.constant 4 : index
    %c112 = arith.constant 112 : index
    %35 = vector.load %arg7[%c4_28, %c112] : memref<10x384xf32, #tpu.memory_space<vmem>>, vector<2x256xf32>
    %36 = tpu.concatenate %33, %34, %35 in 0 : vector<2x256xf32>, vector<2x256xf32>, vector<2x256xf32> -> vector<6x256xf32>
    %37 = arith.truncf %36 : vector<6x256xf32> to vector<6x256xbf16>
    %c2_29 = arith.constant 2 : index
    %c0_30 = arith.constant 0 : index
    %c0_31 = arith.constant 0 : index
    %38 = vector.load %arg4[%c2_29, %c0_30, %c0_31] : memref<4x2x6xbf16, #tpu.memory_space<vmem>>, vector<1x2x6xbf16>
    %39 = vector.shape_cast %38 : vector<1x2x6xbf16> to vector<2x6xbf16>
    %cst_32 = arith.constant dense<0.000000e+00> : vector<2x256xf32>
    %40 = tpu.matmul %39, %37, %cst_32 {dimension_numbers = #tpu.dot_dimension_numbers<[1], [0], [0], [1], [0, 0, 1, 1], [], []>} : vector<2x6xbf16>, vector<6x256xbf16>, vector<2x256xf32> -> vector<2x256xf32>
    %c6 = arith.constant 6 : index
    %c0_33 = arith.constant 0 : index
    %41 = vector.load %arg7[%c6, %c0_33] : memref<10x384xf32, #tpu.memory_space<vmem>>, vector<2x256xf32>
    %c6_34 = arith.constant 6 : index
    %c64_35 = arith.constant 64 : index
    %42 = vector.load %arg7[%c6_34, %c64_35] : memref<10x384xf32, #tpu.memory_space<vmem>>, vector<2x256xf32>
    %c6_36 = arith.constant 6 : index
    %c128 = arith.constant 128 : index
    %43 = vector.load %arg7[%c6_36, %c128] : memref<10x384xf32, #tpu.memory_space<vmem>>, vector<2x256xf32>
    %44 = tpu.concatenate %41, %42, %43 in 0 : vector<2x256xf32>, vector<2x256xf32>, vector<2x256xf32> -> vector<6x256xf32>
    %45 = arith.truncf %44 : vector<6x256xf32> to vector<6x256xbf16>
    %c3 = arith.constant 3 : index
    %c0_37 = arith.constant 0 : index
    %c0_38 = arith.constant 0 : index
    %46 = vector.load %arg4[%c3, %c0_37, %c0_38] : memref<4x2x6xbf16, #tpu.memory_space<vmem>>, vector<1x2x6xbf16>
    %47 = vector.shape_cast %46 : vector<1x2x6xbf16> to vector<2x6xbf16>
    %cst_39 = arith.constant dense<0.000000e+00> : vector<2x256xf32>
    %48 = tpu.matmul %47, %45, %cst_39 {dimension_numbers = #tpu.dot_dimension_numbers<[1], [0], [0], [1], [0, 0, 1, 1], [], []>} : vector<2x6xbf16>, vector<6x256xbf16>, vector<2x256xf32> -> vector<2x256xf32>
    %c8 = arith.constant 8 : index
    %c64_40 = arith.constant 64 : index
    %49 = vector.load %arg7[%c8, %c64_40] : memref<10x384xf32, #tpu.memory_space<vmem>>, vector<2x256xf32>
    %c8_41 = arith.constant 8 : index
    %c48_42 = arith.constant 48 : index
    %50 = vector.load %arg7[%c8_41, %c48_42] : memref<10x384xf32, #tpu.memory_space<vmem>>, vector<2x256xf32>
    %51 = arith.maximumf %49, %50 : vector<2x256xf32>
    %c8_43 = arith.constant 8 : index
    %c80_44 = arith.constant 80 : index
    %52 = vector.load %arg7[%c8_43, %c80_44] : memref<10x384xf32, #tpu.memory_space<vmem>>, vector<2x256xf32>
    %53 = arith.maximumf %51, %52 : vector<2x256xf32>
    %c0_45 = arith.constant 0 : index
    %c0_46 = arith.constant 0 : index
    %54 = vector.load %arg5[%c0_45, %c0_46] : memref<2x1xf32, #tpu.memory_space<vmem>>, vector<2x1xf32>
    %55 = vector.broadcast %54 : vector<2x1xf32> to vector<2x256xf32>
    %56 = arith.mulf %53, %55 : vector<2x256xf32>
    %57 = vector.extract_strided_slice %7 {offsets = [10, 0], sizes = [2, 256], strides = [1, 1]} : vector<24x256xf32> to vector<2x256xf32>
    %58 = vector.extract_strided_slice %7 {offsets = [12, 0], sizes = [12, 256], strides = [1, 1]} : vector<24x256xf32> to vector<12x256xf32>
    %59 = tpu.concatenate %24, %32, %40, %48, %56, %57 in 0 : vector<2x256xf32>, vector<2x256xf32>, vector<2x256xf32>, vector<2x256xf32>, vector<2x256xf32>, vector<2x256xf32> -> vector<12x256xf32>
    %60 = arith.addf %59, %58 : vector<12x256xf32>
    %c0_47 = arith.constant 0 : index
    %c0_48 = arith.constant 0 : index
    %c0_49 = arith.constant 0 : index
    %61 = vector.load %arg6[%c0_47, %c0_48, %c0_49] : memref<1x12x256xf32, #tpu.memory_space<vmem>>, vector<1x12x256xf32>
    %62 = vector.shape_cast %61 : vector<1x12x256xf32> to vector<12x256xf32>
    %63 = vector.shape_cast %60 : vector<12x256xf32> to vector<1x12x256xf32>
    tpu.vector_store %arg6[%c0_47, %c0_48, %c0_49], %63 {strides = array<i32>} : memref<1x12x256xf32, #tpu.memory_space<vmem>>, vector<1x12x256xf32>,
    return
  }
  func.func @transform_0(%arg0: i32) -> (i32, i32, i32) {
    %c0_i32 = arith.constant 0 : i32
    %c0_i32_0 = arith.constant 0 : i32
    %c0_i32_1 = arith.constant 0 : i32
    return %arg0, %c0_i32, %c0_i32_0 : i32, i32, i32
  }
  func.func @transform_1(%arg0: i32) -> (i32, i32) {
    %c0_i32 = arith.constant 0 : i32
    %c0_i32_0 = arith.constant 0 : i32
    %c0_i32_1 = arith.constant 0 : i32
    return %c0_i32, %c0_i32_0 : i32, i32
  }
  func.func @transform_2(%arg0: i32) -> (i32, i32) {
    %c0_i32 = arith.constant 0 : i32
    %c0_i32_0 = arith.constant 0 : i32
    %c0_i32_1 = arith.constant 0 : i32
    return %c0_i32, %c0_i32_0 : i32, i32
  }
  func.func @transform_3(%arg0: i32) -> (i32, i32, i32) {
    %c0_i32 = arith.constant 0 : i32
    %c0_i32_0 = arith.constant 0 : i32
    %c0_i32_1 = arith.constant 0 : i32
    %c0_i32_2 = arith.constant 0 : i32
    return %c0_i32, %c0_i32_0, %c0_i32_1 : i32, i32, i32
  }
  func.func @transform_4(%arg0: i32) -> (i32, i32) {
    %c0_i32 = arith.constant 0 : i32
    %c0_i32_0 = arith.constant 0 : i32
    %c0_i32_1 = arith.constant 0 : i32
    return %c0_i32, %c0_i32_0 : i32, i32
  }
  func.func @transform_5(%arg0: i32) -> (i32, i32, i32) {
    %c0_i32 = arith.constant 0 : i32
    %c0_i32_0 = arith.constant 0 : i32
    %c0_i32_1 = arith.constant 0 : i32
    return %arg0, %c0_i32, %c0_i32_0 : i32, i32, i32
  }
}

</mosaic_0001>

<bundles_post_ra>
// kernel: tpu_custom_call.1
= control target key start
LH: loop header
LB: loop body
LE: loop exit
PB: predicated region body
PF: predicated region fallthrough
CT: control target
= control target key end

     0   :  { %s1095_s18 = smov 0   ;;  %s1325_s0 = inlined_call_operand.vmem [shape: f32[2,4,256], index: 0, kind: input, shape index: {}]   ;;  %s1326_s1 = inlined_call_operand.vmem [shape: bf16[24,4], index: 1, kind: input, shape index: {}]   ;;  %s1327_s2 = inlined_call_operand.vmem [shape: f32[24,1], index: 2, kind: input, shape index: {}]   ;;  %s1328_s3 = inlined_call_operand.vmem [shape: bf16[4,2,6], index: 3, kind: input, shape index: {}]   ;;  %s1329_s4 = inlined_call_operand.vmem [shape: f32[2,1], index: 4, kind: input, shape index: {}]   ;;  %s1330_s5 = inlined_call_operand.vmem [shape: f32[2,12,256], index: 5, kind: output, shape index: {}]  }
   0x1 LB: > { %s949_s19 = sadd.s32 4294967295, %s1055_s18   ;;  %p953_p0 = scmp.ge.s32.totalorder %s1055_s18, 1  ;;  %s1055_s18 = sphi %s1095_s18, %s15_s18  }
   0x2   : > { %p187_p1 = scmp.lt.s32.totalorder %s1055_s18, 3 }
   0x4   : > { %p188_p2 = pnand %p953_p0, %p187_p1 }
   0x5   : > { %p215_p3 = scmp.lt.s32.totalorder (!%p188_p2), %s949_s19, 1  ;;  %v1057_v0 = vmov (!%p188_p2), 0   ;;  %v235_v1 = vld [vmem:[%s1327_s2] sm:$0xff] (!%p188_p2)  ;;  %v236_v2 = vld [vmem:[%s1327_s2 + $0x8] sm:$0xff] (!%p188_p2)  ;;  %vm268_vm0 = vcmask (!%p188_p2), 1041408   ;;  %vm261_vm1 = vcmask (!%p188_p2), 31744  }
   0x6   : > { %191 = sbr.rel (%p188_p2) target bundleno = 898 (0x382), region = 40  ;;  %307 = vmatprep.mubr.bf16.mxu0 (!%p188_p2), %v1057_v0  ;;  %994 = vset.pattern.permute.xlu0 (!%p188_p2), %v1057_v0  ;;  %v1047_v8 = vld [vmem:[%s1326_s1] sm:$0xff] (!%p188_p2)   ;;  %vm336_vm2 = vcmask (!%p188_p2), 523264   ;;  %vm340_vm3 = vcmask (!%p188_p2), 1048064   ;;  %v1058_v9 = vmov (!%p188_p2), 0.0   ;;  %s1059_s30 = smov (!%p188_p2), 64  }
   0x7   : > { %240 = vperm.xlu0 (!%p188_p2), %994, %v235_v1   ;;  %472 = vmatprep.mubr.bf16.mxu1 (!%p188_p2), %v1057_v0  ;;  %337 = vst.msk [vmem:[#allocation2] sm:$0xff] (!%p188_p2), %vm336_vm2, %v1058_v9  ;;  %s1060_s6 = smov (!%p188_p2), 112   ;;  %s1061_s7 = smov (!%p188_p2), 96   ;;  %v1048_v58 = vld [vmem:[%s1326_s1 + $0x8] ss:$0 sps:$4 sm:$0xff] (!%p188_p2)   ;;  %vm385_vm4 = vcmask (!%p188_p2), 916480  }
   0x8   : > { %1045 = vset.pattern.permute.xlu1 (!%p188_p2), %v1057_v0  ;;  %341 = vst.msk [vmem:[#allocation2 + $0x10] sm:$0xff] (!%p188_p2), %vm340_vm3, %v1058_v9  ;;  %s1062_s8 = smov (!%p188_p2), 80   ;;  %s1063_s9 = smov (!%p188_p2), 32   ;;  %vm409_vm5 = vcmask (!%p188_p2), 1043456   ;;  %vm400_vm6 = vcmask (!%p188_p2), 785408   ;;  %vm426_vm7 = vcmask (!%p188_p2), 654336  }
   0x9   : > { %vm624_vm8 = vcmask (!%p188_p2), 261120   ;;  %vm338_vm9 = vcmask (!%p188_p2), 517120   ;;  %vm342_vm10 = vcmask (!%p188_p2), 1041920   ;;  %vm433_vm11 = vcmask (!%p188_p2), 1042432  }
   0xa   : > { %339 = vst.msk [vmem:[#allocation2 + $0x18] sm:$0x3] (!%p188_p2), %vm338_vm9, %v1058_v9  ;;  %vm429_vm12 = vcmask (!%p188_p2), 48128   ;;  %vm800_vm13 = vcmask (!%p188_p2), 130048   ;;  %vm867_vm14 = vcmask (!%p188_p2), 1045504  }
   0xb   : > { %245 = vperm.xlu0 (!%p188_p2), %994, %v236_v2   ;;  %343 = vst.msk [vmem:[#allocation2 + $0x28] sm:$0x3] (!%p188_p2), %vm342_vm10, %v1058_v9 }
   0xd   : > { %s1332_s19 = smov (!%p215_p3, %s949_s19), 1 }
   0xe   : > { %s976_s24 = sshll.u32 %s1332_s19, 3 }
   0xf   : > { %s219_s27 = scalar_lea.vmem %s1325_s0, %s976_s24  ;;  %s1064_s24 = smov 16  }
  0x10   : > { %v226_v3 = vld [vmem:[%s219_s27] sm:$0xff]  ;;  %s977_s27 = sshll.u32 %s1332_s19, 5 }
  0x11   : > { %v228_v4 = vcombine.high %v226_v3, %v226_v3  ;;  %v230_v5 = vpack.c.bf16 %v226_v3, %v226_v3  ;;  %s224_s29 = scalar_lea.vmem %s1330_s5, %s977_s27 }
  0x13   : > { %v231_v6 = vpack.c.bf16 %v228_v4, %v228_v4  ;;  %v270_v7 = vsel %vm268_vm0, %v230_v5, 0 }
  0x15   : > { %960 = vmatprep.subr.msk.bf16.mxu0 %vm268_vm0, %v231_v6 }
  0x16   : > { %276 = vmatpush1.bf16.msra.mxu0 %v270_v7 }
  0x19   : > { %961 = vmatmul.mubr.msk.bf16.vlgmr.msra.gmra.mrb[0].mxu0 %vm261_vm1, %v1047_v8 }
  0x1a   : > { %317 = vmatprep.mubr.bf16.mxu0 %v1057_v0 }
  0x21   : > { %962 = vmatmul.mubr.msk.bf16.gmra.mrb[4].mxu0 %vm261_vm1, %v1048_v58 }
  0x22   : > { %694 = vmatprep.mubr.bf16.mxu0 %v1057_v0 }
  0x86   : > { %v241_v10 = vpop.permute.xlu0 %240 }
  0x8a   : > { %v246_v14 = vpop.permute.xlu0 %245 }
  0xec   : > { %v309_v11 = vpop.f32.mrb[0].mxu0 }
  0xed   : > { %v310_v12 = vadd.f32 %v309_v11, %v241_v10  ;;  %v311_v13 = vpop.f32.mrb[1].mxu0 }
  0xee   : > { %v312_v15 = vadd.f32 %v311_v13, %v241_v10  ;;  %v313_v16 = vpop.f32.mrb[2].mxu0 }
  0xef   : > { %v1130_v17 = vadd.f32 %v313_v16, %v246_v14  ;;  %v315_v18 = vpop.f32.mrb[3].mxu0  ;;  %v326_v20 = vmax.f32 %v310_v12, 0.0 }
  0xf0   : > { %v1132_v19 = vadd.f32 %v315_v18, %v246_v14  ;;  %v327_v22 = vmax.f32 %v312_v15, 0.0 }
  0xf1   : > { %v328_v21 = vmax.f32 %v1130_v17, 0.0 }
  0xf2   : > { %v329_v23 = vmax.f32 %v1132_v19, 0.0  ;;  %v995_v24 = vpack.i.bf16 %v327_v22, %v326_v20 }
  0xf4   : > { %v1136_v25 = vpack.i.bf16 %v329_v23, %v328_v21  ;;  %996 = vrot.lane.b32.xlu1 %v995_v24, %s1059_s30 }
 0x166   : > { %v997_v26 = vpop.permute.xlu1 %996 }
 0x167   : > { %v999_v27 = vunpack.i.h.bf16 %v997_v26  ;;  %v998_v28 = vunpack.i.l.bf16 %v997_v26 }
 0x169   : > { %366 = vst.msk [vmem:[#allocation2 + $0x10] sm:$0xff] %vm336_vm2, %v999_v27  ;;  %v356_v29 = vsel %vm336_vm2, %v998_v28, %v999_v27 }
 0x16a   : > { %364 = vst.msk [vmem:[#allocation2] sm:$0xff] %vm340_vm3, %v998_v28  ;;  %365 = vst [vmem:[#allocation2 + $0x8] sm:$0xff] %v356_v29 }
 0x170   : > { %v372_v30 = vld [vmem:[#allocation2 + $0x10] sm:$0x3]  ;;  %v1160_v49 = vld [vmem:[#allocation2 + $0x10] sm:$0xc]  ;;  %v1173_v56 = vld [vmem:[#allocation2 + $0x10] sm:$0x30] }
 0x171   : > { %v1142_v31 = vld [vmem:[#allocation2] sm:$0x3]  ;;  %v378_v32 = vrot.slane %v372_v30, 6  ;;  %v371_v33 = vld [vmem:[#allocation2 + $0x8] sm:$0x3]  ;;  %v393_v35 = vrot.slane %v372_v30, 4 }
 0x172   : > { %v376_v34 = vrot.slane %v1142_v31, 6  ;;  %v377_v36 = vrot.slane %v371_v33, 6  ;;  %v1145_v37 = vld [vmem:[#allocation2] sm:$0xc]  ;;  %v1147_v38 = vld [vmem:[#allocation2 + $0x8] sm:$0xc] }
 0x173   : > { %383 = vrot.lane.b32.xlu0 %v378_v32, %s1060_s6  ;;  %v391_v40 = vrot.slane %v1142_v31, 4  ;;  %v392_v41 = vrot.slane %v371_v33, 4  ;;  %v1000_v42 = vpack.i.bf16 %v1145_v37, %v393_v35  ;;  %v504_v43 = vrot.slane %v1145_v37, 6  ;;  %v1155_v45 = vld [vmem:[#allocation2] sm:$0x30] }
 0x174   : > { %v1005_v39 = vpack.i.bf16 %v377_v36, %v376_v34  ;;  %v505_v44 = vrot.slane %v1147_v38, 6  ;;  %v1157_v46 = vld [vmem:[#allocation2 + $0x8] sm:$0x30]  ;;  %v603_v50 = vrot.slane %v1155_v45, 2  ;;  %v1015_v52 = vpack.i.bf16 %v1160_v49, %v1147_v38 }
 0x175   : > { %v1010_v47 = vpack.i.bf16 %v392_v41, %v391_v40  ;;  %v604_v51 = vrot.slane %v1157_v46, 2  ;;  %v506_v54 = vrot.slane %v1160_v49, 6  ;;  %v1030_v55 = vpack.i.bf16 %v1157_v46, %v1155_v45 }
 0x176   : > { %1006 = vrot.lane.b32.xlu1 %v1005_v39, %s1060_s6  ;;  %v1020_v48 = vpack.i.bf16 %v505_v44, %v504_v43  ;;  %v605_v57 = vrot.slane %v1173_v56, 2  ;;  %v489_v35 = vrot.slane %v1160_v49, 2 }
 0x177   : > { %1001 = vrot.lane.b32.xlu0 %v1000_v42, %s1061_s7  ;;  %v1025_v53 = vpack.i.bf16 %v604_v51, %v603_v50  ;;  %v1208_v42 = vld [vmem:[#allocation2 + $0x8] sm:$0xc0] }
 0x17a   : > { %1011 = vrot.lane.b32.xlu1 %v1010_v47, %s1061_s7 }
 0x17b   : > { %1021 = vrot.lane.b32.xlu0 %v1020_v48, %s1059_s30 }
 0x17e   : > { %1016 = vrot.lane.b32.xlu1 %v1015_v52, %s1061_s7 }
 0x17f   : > { %1026 = vrot.lane.b32.xlu0 %v1025_v53, %s1062_s8 }
 0x182   : > { %511 = vrot.lane.b32.xlu1 %v506_v54, %s1059_s30 }
 0x183   : > { %1031 = vrot.lane.b32.xlu0 %v1030_v55, %s1063_s9  ;;  %v714_v55 = vrot.slane %v1208_v42, 4 }
 0x186   : > { %610 = vrot.lane.b32.xlu1 %v605_v57, %s1062_s8 }
 0x18a   : > { %622 = vrot.lane.b32.xlu1 %v1173_v56, %s1063_s9 }
 0x1e5   : > { %v384_v59 = vpop.permute.xlu0 %383 }
 0x1e6   : > { %v408_v2 = vsel %vm268_vm0, %v372_v30, %v384_v59  ;;  %v487_v30 = vrot.slane %v1145_v37, 2 }
 0x1e8   : > { %v1007_v60 = vpop.permute.xlu1 %1006 }
 0x1e9   : > { %v1009_v61 = vunpack.i.h.bf16 %v1007_v60  ;;  %v1008_v62 = vunpack.i.l.bf16 %v1007_v60  ;;  %v1002_v63 = vpop.permute.xlu0 %1001  ;;  %v597_v60 = vrot.slane %v1155_v45, 4 }
 0x1ea   : > { %v1003_v1 = vunpack.i.l.bf16 %v1002_v63  ;;  %v1004_v20 = vunpack.i.h.bf16 %v1002_v63 }
 0x1eb   : > { %v387_v3 = vsel %vm385_vm4, %v1009_v61, %v384_v59  ;;  %v386_v4 = vsel %vm385_vm4, %v1008_v62, %v1009_v61 }
 0x1ec   : > { %v1012_v5 = vpop.permute.xlu1 %1011  ;;  %v412_v6 = vsel %vm409_vm5, %v408_v2, %v1003_v1  ;;  %v407_v12 = vsel %vm268_vm0, %v371_v33, %v387_v3  ;;  %v406_v13 = vsel %vm268_vm0, %v1142_v31, %v386_v4  ;;  %v488_v31 = vrot.slane %v1147_v38, 2  ;;  %v1206_v38 = vld [vmem:[#allocation2] sm:$0xc0]  ;;  %v705_v3 = vld [vmem:[#allocation2 + $0x10] sm:$0xc0] }
 0x1ed   : > { %v1014_v7 = vunpack.i.h.bf16 %v1012_v5  ;;  %v1013_v8 = vunpack.i.l.bf16 %v1012_v5  ;;  %v1022_v10 = vpop.permute.xlu0 %1021  ;;  %v415_v11 = vpack.c.bf16 %v412_v6, %v412_v6  ;;  %v713_v54 = vrot.slane %v1206_v38, 4 }
 0x1ee   : > { %v1024_v16 = vunpack.i.h.bf16 %v1022_v10  ;;  %v1023_v18 = vunpack.i.l.bf16 %v1022_v10  ;;  %v598_v5 = vrot.slane %v1157_v46, 4  ;;  %v599_v6 = vrot.slane %v1173_v56, 4 }
 0x1ef   : > { %v402_v14 = vsel %vm400_vm6, %v1014_v7, %v1003_v1  ;;  %v401_v15 = vsel %vm400_vm6, %v1013_v8, %v1014_v7  ;;  %424 = vrot.lane.b32.xlu0 %v415_v11, %s1062_s8  ;;  %v1035_v63 = vpack.i.bf16 %v714_v55, %v713_v54  ;;  %v715_v10 = vrot.slane %v705_v3, 4 }
 0x1f0   : > { %v1017_v21 = vpop.permute.xlu1 %1016  ;;  %v411_v22 = vsel %vm409_vm5, %v407_v12, %v402_v14  ;;  %v410_v23 = vsel %vm409_vm5, %v406_v13, %v401_v15  ;;  %v513_v32 = vsel %vm336_vm2, %v1023_v18, %v1024_v16  ;;  %v823_v14 = vld [vmem:[%s1329_s4] sm:$0x3] }
 0x1f1   : > { %v1019_v24 = vunpack.i.h.bf16 %v1017_v21  ;;  %v1018_v26 = vunpack.i.l.bf16 %v1017_v21  ;;  %v1027_v27 = vpop.permute.xlu0 %1026  ;;  %v414_v28 = vpack.c.bf16 %v411_v22, %v411_v22  ;;  %v413_v29 = vpack.c.bf16 %v410_v23, %v410_v23  ;;  %v416_v23 = vld [vmem:[%s1328_s3] sm:$0x1] }
 0x1f2   : > { %v1029_v36 = vunpack.i.h.bf16 %v1027_v27  ;;  %v1028_v39 = vunpack.i.l.bf16 %v1027_v27 }
 0x1f3   : > { %v499_v33 = vsel %vm400_vm6, %v1004_v20, %v1018_v26  ;;  %v500_v34 = vsel %vm400_vm6, %v1018_v26, %v1019_v24  ;;  %422 = vrot.lane.b32.xlu1 %v414_v28, %s1062_s8  ;;  %420 = vrot.lane.b32.xlu0 %v413_v29, %s1062_s8  ;;  %v520_v44 = vsel %vm268_vm0, %v489_v35, %v1019_v24  ;;  %v965_v35 = vld [vmem:[%s1328_s3 + $0x1] sm:$0x1] }
 0x1f4   : > { %v512_v40 = vpop.permute.xlu1 %511  ;;  %v519_v41 = vsel %vm268_vm0, %v488_v31, %v500_v34  ;;  %v518_v37 = vsel %vm268_vm0, %v487_v30, %v499_v33  ;;  %v613_v59 = vsel %vm426_vm7, %v1028_v39, %v1029_v36  ;;  %v709_v39 = vrot.slane %v1208_v42, 6 }
 0x1f5   : > { %v514_v43 = vsel %vm336_vm2, %v1024_v16, %v512_v40  ;;  %v1032_v47 = vpop.permute.xlu0 %1031  ;;  %v521_v48 = vsel %vm409_vm5, %v518_v37, %v513_v32  ;;  %v523_v57 = vsel %vm409_vm5, %v520_v44, %v512_v40  ;;  %v630_v1 = vsel %vm268_vm0, %v597_v60, %v613_v59 }
 0x1f6   : > { %v522_v49 = vsel %vm409_vm5, %v519_v41, %v514_v43  ;;  %v1034_v50 = vunpack.i.h.bf16 %v1032_v47  ;;  %v1033_v51 = vunpack.i.l.bf16 %v1032_v47  ;;  %v524_v52 = vpack.c.bf16 %v521_v48, %v521_v48 }
 0x1f7   : > { %v525_v53 = vpack.c.bf16 %v522_v49, %v522_v49  ;;  %v526_v62 = vpack.c.bf16 %v523_v57, %v523_v57  ;;  %v708_v32 = vrot.slane %v1206_v38, 6  ;;  %v727_v38 = vrot.slane %v705_v3, 2  ;;  %v971_v57 = vld [vmem:[%s1328_s3 + $0x3] sm:$0x1] }
 0x1f8   : > { %v611_v58 = vpop.permute.xlu1 %610  ;;  %532 = vrot.lane.b32.xlu1 %v524_v52, %s1061_s7  ;;  %v625_v61 = vsel %vm624_vm8, %v1033_v51, %v1034_v50 }
 0x1f9   : > { %534 = vrot.lane.b32.xlu0 %v525_v53, %s1061_s7  ;;  %v614_v45 = vsel %vm426_vm7, %v1029_v36, %v611_v58  ;;  %v633_v4 = vsel %vm409_vm5, %v630_v1, %v625_v61  ;;  %v632_v9 = vsel %vm268_vm0, %v599_v6, %v611_v58  ;;  %v726_v36 = vrot.slane %v1208_v42, 2 }
 0x1fa   : > { %v631_v8 = vsel %vm268_vm0, %v598_v5, %v614_v45  ;;  %v636_v11 = vpack.c.bf16 %v633_v4, %v633_v4  ;;  %v319_v45 = vpop.f32.mrb[4].mxu0  ;;  %v237_v5 = vld [vmem:[%s1327_s2 + $0x10] sm:$0xff] }
 0x1fc   : > { %v623_v2 = vpop.permute.xlu1 %622  ;;  %536 = vrot.lane.b32.xlu1 %v526_v62, %s1061_s7 }
 0x1fd   : > { %v626_v7 = vsel %vm624_vm8, %v1034_v50, %v623_v2  ;;  %1036 = vrot.lane.b32.xlu0 %v1035_v63, %s1059_s30  ;;  %v635_v13 = vsel %vm409_vm5, %v632_v9, %v623_v2  ;;  %v321_v2 = vpop.f32.mrb[5].mxu0 }
 0x1fe   : > { %v634_v12 = vsel %vm409_vm5, %v631_v8, %v626_v7  ;;  %v638_v46 = vpack.c.bf16 %v635_v13, %v635_v13  ;;  %v323_v3 = vpop.f32.mrb[6].mxu0 }
 0x1ff   : > { %v637_v56 = vpack.c.bf16 %v634_v12, %v634_v12  ;;  %v324_v4 = vpop.f32.mrb[7].mxu0 }
 0x200   : > { %720 = vrot.lane.b32.xlu1 %v715_v10, %s1059_s30 }
 0x201   : > { %644 = vrot.lane.b32.xlu0 %v636_v11, %s1060_s6 }
 0x204   : > { %646 = vrot.lane.b32.xlu1 %v637_v56, %s1060_s6 }
 0x205   : > { %648 = vrot.lane.b32.xlu0 %v638_v46, %s1060_s6 }
 0x208   : > { %1041 = vrot.lane.b32.xlu1 %v1136_v25, %s1059_s30 }
 0x209   : > { %826 = vperm.xlu0 %994, %v823_v14  }
 0x261   : > { %v425_v15 = vpop.permute.xlu0 %424 }
 0x265   : > { %v423_v16 = vpop.permute.xlu1 %422  ;;  %v421_v18 = vpop.permute.xlu0 %420 }
 0x266   : > { %v428_v20 = vsel %vm426_vm7, %v423_v16, %v425_v15  ;;  %v427_v21 = vsel %vm426_vm7, %v421_v18, %v423_v16 }
 0x267   : > { %963 = vmatprep.subr.msk.bf16.mxu1 %vm433_vm11, %v428_v20  ;;  %v435_v22 = vsel %vm433_vm11, %v427_v21, 0 }
 0x268   : > { %441 = vmatpush1.bf16.msra.mxu1 %v435_v22 }
 0x26a   : > { %v533_v25 = vpop.permute.xlu1 %532 }
 0x26b   : > { %v535_v24 = vpop.permute.xlu0 %534  ;;  %964 = vmatmul.mubr.msk.bf16.vlgmr.msra.gmra.mrb[0].mxu1 %vm429_vm12, %v416_v23 }
 0x26c   : > { %582 = vmatprep.mubr.bf16.mxu1 %v1057_v0  ;;  %v539_v26 = vsel %vm400_vm6, %v533_v25, %v535_v24 }
 0x26d   : > { %v545_v33 = vsel %vm433_vm11, %v539_v26, 0 }
 0x26e   : > { %v537_v27 = vpop.permute.xlu1 %536 }
 0x26f   : > { %v1037_v28 = vpop.permute.xlu0 %1036  ;;  %v540_v29 = vsel %vm400_vm6, %v535_v24, %v537_v27 }
 0x270   : > { %v1039_v30 = vunpack.i.h.bf16 %v1037_v28  ;;  %v1038_v31 = vunpack.i.l.bf16 %v1037_v28  ;;  %966 = vmatprep.subr.msk.bf16.mxu1 %vm433_vm11, %v540_v29 }
 0x271   : > { %551 = vmatpush1.bf16.msra.mxu1 %v545_v33 }
 0x272   : > { %v722_v34 = vsel %vm336_vm2, %v1038_v31, %v1039_v30  ;;  %v721_v40 = vpop.permute.xlu1 %720 }
 0x273   : > { %v645_v41 = vpop.permute.xlu0 %644  ;;  %v730_v37 = vsel %vm268_vm0, %v708_v32, %v722_v34  ;;  %v723_v43 = vsel %vm336_vm2, %v1039_v30, %v721_v40 }
 0x274   : > { %v732_v44 = vsel %vm409_vm5, %v730_v37, %v726_v36  ;;  %v731_v47 = vsel %vm268_vm0, %v709_v39, %v723_v43  ;;  %967 = vmatmul.mubr.msk.bf16.vlgmr.msra.gmra.mrb[4].mxu1 %vm429_vm12, %v965_v35 }
 0x275   : > { %v734_v48 = vpack.c.bf16 %v732_v44, %v732_v44  ;;  %v733_v49 = vsel %vm409_vm5, %v731_v47, %v727_v38  ;;  %779 = vmatprep.mubr.bf16.mxu1 %v1057_v0  ;;  %v968_v0 = vld [vmem:[%s1328_s3 + $0x2] sm:$0x1] }
 0x276   : > { %v735_v50 = vpack.c.bf16 %v733_v49, %v733_v49  ;;  %v647_v42 = vpop.permute.xlu1 %646 }
 0x277   : > { %v649_v51 = vpop.permute.xlu0 %648  ;;  %v742_v52 = vsel %vm433_vm11, %v734_v48, 0  ;;  %v651_v53 = vsel %vm385_vm4, %v645_v41, %v647_v42 }
 0x278   : > { %v652_v54 = vsel %vm385_vm4, %v647_v42, %v649_v51  ;;  %v657_v55 = vsel %vm433_vm11, %v651_v53, 0  ;;  %972 = vmatprep.subr.msk.bf16.mxu1 %vm433_vm11, %v735_v50  ;;  %v876_v51 = vrot.slane %v1130_v17, 4 }
 0x279   : > { %969 = vmatprep.subr.msk.bf16.mxu0 %vm433_vm11, %v652_v54  ;;  %748 = vmatpush1.bf16.msra.mxu1 %v742_v52 }
 0x27a   : > { %663 = vmatpush1.bf16.msra.mxu0 %v657_v55  ;;  %v1042_v58 = vpop.permute.xlu1 %1041 }
 0x27b   : > { %v1044_v59 = vunpack.i.h.bf16 %v1042_v58  ;;  %v1043_v60 = vunpack.i.l.bf16 %v1042_v58 }
 0x27c   : > { %973 = vmatmul.mubr.msk.bf16.vlgmr.msra.gmra.mrb[8].mxu1 %vm429_vm12, %v971_v57 }
 0x27d   : > { %970 = vmatmul.mubr.msk.bf16.vlgmr.msra.gmra.mrb[8].mxu0 %vm429_vm12, %v968_v0  ;;  %369 = vst.msk [vmem:[#allocation2 + $0x28] sm:$0x3] %vm338_vm9, %v1044_v59  ;;  %v357_v61 = vsel %vm336_vm2, %v1043_v60, %v1044_v59  ;;  %v879_v0 = vrot.slane %v1132_v19, 4 }
 0x27e   : > { %367 = vst.msk [vmem:[#allocation2 + $0x18] sm:$0x3] %vm342_vm10, %v1043_v60  ;;  %368 = vst [vmem:[#allocation2 + $0x20] sm:$0x3] %v357_v61 }
 0x284   : > { %v790_v1 = vld [vmem:[#allocation2 + $0x28] sm:$0x3] }
 0x285   : > { %v788_v62 = vld [vmem:[#allocation2 + $0x18] sm:$0x3]  ;;  %v789_v63 = vld [vmem:[#allocation2 + $0x20] sm:$0x3] }
 0x286   : > { %794 = vrot.lane.b32.xlu1 %v788_v62, %s1064_s24  ;;  %796 = vrot.lane.b32.xlu0 %v789_v63, %s1064_s24 }
 0x288   : > { %v827_v6 = vpop.permute.xlu0 %826 }
 0x28a   : > { %798 = vrot.lane.b32.xlu1 %v790_v1, %s1064_s24  ;;  %809 = vrot.lane.b32.xlu0 %v788_v62, %s1060_s6 }
 0x28e   : > { %811 = vrot.lane.b32.xlu1 %v789_v63, %s1060_s6  ;;  %813 = vrot.lane.b32.xlu0 %v790_v1, %s1060_s6 }
 0x292   : > { %250 = vperm.xlu1 %1045, %v237_v5  }
 0x2f8   : > { %v795_v7 = vpop.permute.xlu1 %794  ;;  %v797_v8 = vpop.permute.xlu0 %796 }
 0x2f9   : > { %v801_v11 = vsel %vm800_vm13, %v795_v7, %v797_v8  ;;  %v806_v13 = vmax.f32 %v788_v62, %v795_v7 }
 0x2fa   : > { %v807_v56 = vmax.f32 %v789_v63, %v801_v11 }
 0x2fc   : > { %v799_v9 = vpop.permute.xlu1 %798  ;;  %v810_v10 = vpop.permute.xlu0 %809 }
 0x2fd   : > { %v802_v12 = vsel %vm800_vm13, %v797_v8, %v799_v9 }
 0x2fe   : > { %v808_v16 = vmax.f32 %v790_v1, %v802_v12 }
 0x300   : > { %v812_v46 = vpop.permute.xlu1 %811  ;;  %v814_v15 = vpop.permute.xlu0 %813 }
 0x301   : > { %v815_v14 = vsel %vm385_vm4, %v810_v10, %v812_v46  ;;  %v816_v20 = vsel %vm385_vm4, %v812_v46, %v814_v15  ;;  %v822_v22 = vmax.f32 %v808_v16, %v814_v15 }
 0x302   : > { %v820_v18 = vmax.f32 %v806_v13, %v815_v14  ;;  %v821_v21 = vmax.f32 %v807_v56, %v816_v20 }
 0x303   : > { %v831_v24 = vmul.f32 %v827_v6, %v822_v22 }
 0x304   : > { %v829_v23 = vmul.f32 %v827_v6, %v820_v18  ;;  %v830_v25 = vmul.f32 %v827_v6, %v821_v21 }
 0x306   : > { %853 = vrot.lane.b32.xlu0 %v829_v23, %s1059_s30  ;;  %855 = vrot.lane.b32.xlu1 %v830_v25, %s1059_s30 }
 0x30a   : > { %857 = vrot.lane.b32.xlu0 %v831_v24, %s1059_s30 }
 0x311   : > { %v251_v31 = vpop.permute.xlu1 %250 }
 0x312   : > { %v320_v40 = vadd.f32 %v319_v45, %v251_v31  ;;  %v322_v37 = vadd.f32 %v321_v2, %v251_v31 }
 0x314   : > { %v877_v38 = vrot.slane %v320_v40, 4  ;;  %v880_v47 = vrot.slane %v322_v37, 4 }
 0x316   : > { %v878_v60 = vsel %vm409_vm5, %v876_v51, %v877_v38  ;;  %v881_v63 = vsel %vm409_vm5, %v879_v0, %v880_v47 }
 0x33e   : > { %v474_v26 = vpop.f32.mrb[0].mxu1 }
 0x33f   : > { %v476_v27 = vpop.f32.mrb[1].mxu1 }
 0x340   : > { %v478_v28 = vpop.f32.mrb[2].mxu1 }
 0x341   : > { %v479_v29 = vpop.f32.mrb[3].mxu1 }
 0x347   : > { %v584_v30 = vpop.f32.mrb[4].mxu1 }
 0x348   : > { %v834_v32 = vrot.slane %v584_v30, 6  ;;  %v586_v33 = vpop.f32.mrb[5].mxu1 }
 0x349   : > { %v835_v34 = vrot.slane %v586_v33, 6  ;;  %v588_v35 = vpop.f32.mrb[6].mxu1 }
 0x34a   : > { %v863_v36 = vsel %vm268_vm0, %v474_v26, %v834_v32  ;;  %v589_v39 = vpop.f32.mrb[7].mxu1 }
 0x34b   : > { %v864_v41 = vsel %vm268_vm0, %v476_v27, %v835_v34 }
 0x34f   : > { %v781_v44 = vpop.f32.mrb[8].mxu1 }
 0x350   : > { %v696_v43 = vpop.f32.mrb[8].mxu0  ;;  %v846_v50 = vrot.slane %v781_v44, 2  ;;  %v783_v42 = vpop.f32.mrb[9].mxu1 }
 0x351   : > { %v840_v48 = vrot.slane %v696_v43, 4  ;;  %v698_v49 = vpop.f32.mrb[9].mxu0  ;;  %v847_v53 = vrot.slane %v783_v42, 2  ;;  %v785_v55 = vpop.f32.mrb[10].mxu1 }
 0x352   : > { %v841_v52 = vrot.slane %v698_v49, 4  ;;  %v700_v54 = vpop.f32.mrb[10].mxu0  ;;  %v786_v59 = vpop.f32.mrb[11].mxu1 }
 0x353   : > { %v865_v57 = vsel %vm409_vm5, %v863_v36, %v840_v48  ;;  %v701_v58 = vpop.f32.mrb[11].mxu0 }
 0x354   : > { %v866_v61 = vsel %vm409_vm5, %v864_v41, %v841_v52  ;;  %v868_v62 = vsel %vm867_vm14, %v865_v57, %v846_v50 }
 0x355   : > { %v886_v1 = vadd.f32 %v878_v60, %v868_v62  ;;  %v869_v45 = vsel %vm867_vm14, %v866_v61, %v847_v53 }
 0x356   : > { %v887_v2 = vadd.f32 %v881_v63, %v869_v45 }
 0x357   : > { %890 = vst [vmem:[%s224_s29] sm:$0xff] %v886_v1 }
 0x358   : > { %891 = vst [vmem:[%s224_s29 + $0x8] sm:$0xff] %v887_v2 }
 0x378   : > { %v854_v3 = vpop.permute.xlu0 %853  ;;  %v856_v4 = vpop.permute.xlu1 %855 }
 0x379   : > { %v859_v5 = vsel %vm336_vm2, %v854_v3, %v856_v4 }
 0x37a   : > { %v870_v6 = vsel %vm268_vm0, %v859_v5, %v1130_v17 }
 0x37b   : > { %v888_v7 = vadd.f32 %v877_v38, %v870_v6 }
 0x37c   : > { %v858_v8 = vpop.permute.xlu0 %857 }
 0x37d   : > { %v860_v9 = vsel %vm336_vm2, %v856_v4, %v858_v8  ;;  %892 = vst [vmem:[%s224_s29 + $0x10] sm:$0xf] %v888_v7 }
 0x37e   : > { %v871_v10 = vsel %vm268_vm0, %v860_v9, %v1132_v19 }
 0x37f   : > { %v889_v11 = vadd.f32 %v880_v47, %v871_v10 }
 0x381   : > { %893 = vst [vmem:[%s224_s29 + $0x18] sm:$0xf] %v889_v11 }
 0x382 PF: > { %s15_s18 = sadd.s32 1, %s1055_s18  }
 0x383   : > { %p12_p4 = scmp.ge.s32.totalorder %s15_s18, 4  }
 0x385   :  { %14 = sbr.rel (!%p12_p4) target bundleno = 1 (0x1), region = 73 }

</bundles_post_ra>
